<compile_context>
chip_gen: v7x
topology: tpu7x:2x2x1
jax: 0.10.0
libtpu: 0.0.40
codegen_flags: <defaults>
</compile_context>

<pallas_src>
import jax
import jax.numpy as jnp
from jax import lax
from jax.experimental import pallas as pl
from jax.experimental.pallas import tpu as pltpu

# ---- problem constants (from the PyTorch module) ----------------------------
L_IN = 20            # input sequence length
C_IN = 1
C_MID = 32
C_OUT = 64
K = 3
L_MID = L_IN // 2    # 10 after first max-pool
L_OUT = L_MID // 2   # 5  after second max-pool

# ---- kernel tiling constants -------------------------------------------------
BB = 8               # sequences per grid block -> R = BB*L_OUT = 40 rows / phase
K_PAD = 8            # conv1 taps zero-padded 3 -> 8 for the MXU contraction

# ---- packed parameter / constant buffer layout (one DMA for everything) ------
P_LANES = 128
ROW_W2 = 0                # rows [0, 96)   lanes [0, 64): conv2 weight, im2col-packed
ROW_W1 = K * C_MID        # rows [96, 104) lanes [0, 32): conv1 weight (K_PAD taps)
ROW_B1 = ROW_W1 + K_PAD   # row  104       lanes [0, 32): conv1 bias
ROW_B2 = ROW_B1 + 1       # row  105       lanes [0, 64): conv2 bias
P_ROWS = 112              # rounded up to a multiple of 8 sublanes
LANE_KEEP_PREV = 120      # rows [0, BB*L_OUT): 0.0 where j == 0         else 1.0
LANE_KEEP_NEXT = 121      # rows [0, BB*L_OUT): 0.0 where j == L_OUT - 1 else 1.0


def cnn_kernel(x_ref, p_ref, o_ref):
    """Fused conv1 -> relu -> pool -> conv2 -> relu -> pool for BB sequences.

    x_ref : (4*BB*L_OUT, K_PAD)  layer-1 im2col rows ordered (r, b, j) where
                                 r = conv1 output position mod 4; taps padded.
    p_ref : (P_ROWS, P_LANES)    packed w1/b1/w2/b2 + boundary masks.
    o_ref : (BB*L_OUT, C_OUT)    rows ordered (b, j).
    """
    R = BB * L_OUT                                                # 40

    # Free static views into the single packed parameter buffer.
    w1 = p_ref[ROW_W1:ROW_W1 + K_PAD, 0:C_MID]                    # (8, 32), taps 3..7 zero
    b1 = p_ref[ROW_B1:ROW_B1 + 1, 0:C_MID]                        # (1, 32)
    w2 = p_ref[ROW_W2:ROW_W2 + K * C_MID, 0:C_OUT]                # (96, 64)
    b2 = p_ref[ROW_B2:ROW_B2 + 1, 0:C_OUT]                        # (1, 64)
    keep_prev = p_ref[0:R, LANE_KEEP_PREV:LANE_KEEP_PREV + 1]     # (R, 1)
    keep_next = p_ref[0:R, LANE_KEEP_NEXT:LANE_KEEP_NEXT + 1]     # (R, 1)

    # ---- layer 1: conv1d(1->32, k=3, pad=1) + bias + relu, one MXU matmul.
    a1 = jnp.maximum(
        jnp.dot(x_ref[...], w1, preferred_element_type=jnp.float32) + b1,
        0.0)                                                      # (4R, 32)

    # max_pool1d(2) #1: phase groups are row blocks -> plain maxima, no strides.
    p1_even = jnp.maximum(a1[0 * R:1 * R], a1[1 * R:2 * R])       # (R, 32)  p1[2j]
    p1_odd = jnp.maximum(a1[2 * R:3 * R], a1[3 * R:4 * R])        # (R, 32)  p1[2j+1]

    # ---- layer 2 im2col: neighbours shifted by one row, zeroed at sequence
    # boundaries (conv zero padding).  Rows are (b, j); masks come prepacked.
    zrow = jnp.zeros((1, C_MID), jnp.float32)
    sh_odd = keep_prev * jnp.concatenate([zrow, p1_odd[:R - 1]], axis=0)    # p1[2j-1]
    sh_even = keep_next * jnp.concatenate([p1_even[1:], zrow], axis=0)      # p1[2j+2]

    # Even and odd conv2 outputs stacked on rows -> ONE fused MXU matmul.
    cols = jnp.concatenate(
        [jnp.concatenate([sh_odd, p1_even, p1_odd], axis=1),      # conv2[2j]
         jnp.concatenate([p1_even, p1_odd, sh_even], axis=1)],    # conv2[2j+1]
        axis=0)                                                   # (2R, 96)
    res = jnp.dot(cols, w2, preferred_element_type=jnp.float32)   # (2R, 64)

    # bias + relu + max_pool1d(2) #2, fused and kept in registers.
    o_ref[...] = jnp.maximum(jnp.maximum(res[0:R], res[R:2 * R]) + b2, 0.0)


def pack_params(w1, b1, w2, b2):
    """One-time repack of PyTorch-layout weights into a single kernel buffer."""
    w1p = jnp.transpose(w1[:, 0, :], (1, 0))                       # (K, C_MID)  [k, c]
    # row k*C_MID + c_in of w2p == w2[:, c_in, k]  (matches im2col lane order)
    w2p = jnp.transpose(w2, (2, 1, 0)).reshape(K * C_MID, C_OUT)   # (96, 64)
    p = jnp.zeros((P_ROWS, P_LANES), jnp.float32)
    p = p.at[ROW_W2:ROW_W2 + K * C_MID, :C_OUT].set(w2p)
    p = p.at[ROW_W1:ROW_W1 + K, :C_MID].set(w1p)
    p = p.at[ROW_B1, :C_MID].set(b1)
    p = p.at[ROW_B2, :C_OUT].set(b2)
    # Sequence-boundary masks for the conv2 zero-padding taps.
    j = jnp.arange(BB * L_OUT) % L_OUT
    p = p.at[:BB * L_OUT, LANE_KEEP_PREV].set((j != 0).astype(jnp.float32))
    p = p.at[:BB * L_OUT, LANE_KEEP_NEXT].set((j != L_OUT - 1).astype(jnp.float32))
    return p


@jax.jit
def cnn_forward_packed(x, params):
    """x: (B, 1, 20) NCL float32; params pre-packed with pack_params -> (B, 64, 5)."""
    B = x.shape[0]
    G = -(-B // BB)                       # grid blocks (static, from the shape)
    BP = G * BB
    R = BB * L_OUT

    xs = x.reshape(B, L_IN).astype(jnp.float32)
    if BP > B:                            # pad the batch up to a whole block
        xs = jnp.pad(xs, ((0, BP - B), (0, 0)))
    xp = jnp.pad(xs, ((0, 0), (1, 1)))    # conv1 zero padding, (BP, 22)

    # Layer-1 im2col grouped by output position mod 4 -- static slices only, no
    # gather:  x1[((g*4 + r)*BB + b)*L_OUT + j, k] = xp[g*BB + b, 4j + r + k].
    taps = [xp[:, k:k + L_IN].reshape(BP, L_OUT, 4) for k in range(K)]   # [b, j, r]
    x1 = jnp.stack(taps, axis=-1)                          # (BP, L_OUT, 4, K)
    x1 = x1.transpose(0, 2, 1, 3)                          # (BP, 4, L_OUT, K)
    x1 = x1.reshape(G, BB, 4, L_OUT, K).transpose(0, 2, 1, 3, 4)
    x1 = x1.reshape(G * 4 * R, K)
    x1 = jnp.pad(x1, ((0, 0), (0, K_PAD - K)))             # K padded 3 -> 8

    flops = G * (2 * 4 * R * K_PAD * C_MID + 2 * 2 * R * K * C_MID * C_OUT)
    bytes_accessed = 4 * (x1.size + params.size + G * R * C_OUT)

    out = pl.pallas_call(
        cnn_kernel,
        out_shape=jax.ShapeDtypeStruct((G * R, C_OUT), jnp.float32),
        grid=(G,),
        in_specs=[
            pl.BlockSpec((4 * R, K_PAD), lambda g: (g, 0)),
            pl.BlockSpec((P_ROWS, P_LANES), lambda g: (0, 0)),   # fetched once
        ],
        out_specs=pl.BlockSpec((R, C_OUT), lambda g: (g, 0)),
        compiler_params=pltpu.CompilerParams(
            dimension_semantics=("parallel",)),
        cost_estimate=pl.CostEstimate(
            flops=flops, transcendentals=0, bytes_accessed=bytes_accessed),
    )(x1, params)                                           # (G*R, 64), rows (b, j)

    # Back to PyTorch NCL convention with one transpose for the whole batch.
    return out.reshape(BP, L_OUT, C_OUT)[:B].transpose(0, 2, 1)


def cnn_forward(x, w1, b1, w2, b2):
    """Convenience wrapper taking PyTorch-layout parameters."""
    return cnn_forward_packed(x, pack_params(w1, b1, w2, b2))


def ref_forward(x, w1, b1, w2, b2):
    """Pure-JAX reference matching F.conv1d / F.max_pool1d semantics."""
    def conv1d(x, w, b):
        y = lax.conv_general_dilated(
            x, w, window_strides=(1,), padding=((1, 1),),
            dimension_numbers=("NCH", "OIH", "NCH"),
            precision=lax.Precision.HIGHEST)
        return y + b[None, :, None]

    def maxpool2(x):
        n, c, l = x.shape
        return jnp.max(x.reshape(n, c, l // 2, 2), axis=-1)

    h = maxpool2(jax.nn.relu(conv1d(x, w1, b1)))
    return maxpool2(jax.nn.relu(conv1d(h, w2, b2)))


if __name__ == "__main__":
    key = jax.random.PRNGKey(0)
    kx, k1, k2, k3, k4, kb = jax.random.split(key, 6)

    # Deterministic parameter init (PyTorch-style uniform +-1/sqrt(fan_in)).
    bound1 = 1.0 / (C_IN * K) ** 0.5
    w1 = jax.random.uniform(k1, (C_MID, C_IN, K), jnp.float32, -bound1, bound1)
    b1 = jax.random.uniform(k2, (C_MID,), jnp.float32, -bound1, bound1)
    bound2 = 1.0 / (C_MID * K) ** 0.5
    w2 = jax.random.uniform(k3, (C_OUT, C_MID, K), jnp.float32, -bound2, bound2)
    b2 = jax.random.uniform(k4, (C_OUT,), jnp.float32, -bound2, bound2)
    params = pack_params(w1, b1, w2, b2)

    # Module-spec shape: a single (1, 1, 20) sequence.
    x = jax.random.normal(kx, (1, C_IN, L_IN), jnp.float32)
    out = jax.block_until_ready(cnn_forward_packed(x, params))
    ref = jax.block_until_ready(ref_forward(x, w1, b1, w2, b2))
    assert out.shape == (1, C_OUT, L_OUT), out.shape
    assert jnp.allclose(out, ref, atol=1e-4, rtol=1e-4), \
        float(jnp.max(jnp.abs(out - ref)))

    # Batched path: exercises the parallel grid axis (G=2) and batch padding.
    xb = jax.random.normal(kb, (12, C_IN, L_IN), jnp.float32)
    outb = jax.block_until_ready(cnn_forward_packed(xb, params))
    refb = jax.block_until_ready(ref_forward(xb, w1, b1, w2, b2))
    assert outb.shape == (12, C_OUT, L_OUT), outb.shape
    assert jnp.allclose(outb, refb, atol=1e-4, rtol=1e-4), \
        float(jnp.max(jnp.abs(outb - refb)))

    print("KERNEL_OK")
</pallas_src>

<mosaic_0001>
module attributes {stable_mosaic.version = 11 : i64} {
  func.func @cnn_kernel(%arg0: i32, %arg1: memref<160x8xf32, #tpu.memory_space<vmem>>, %arg2: memref<112x128xf32, #tpu.memory_space<vmem>>, %arg3: memref<40x64xf32, #tpu.memory_space<vmem>>) attributes {dimension_semantics = [#tpu.dimension_semantics<parallel>], iteration_bounds = array<i64: 1>, scalar_prefetch = 0 : i64, scratch_operands = 0 : i64, tpu.core_type = #tpu.core_type<tc>, window_params = [{transform_indices = @transform_0, window_bounds = array<i64: 160, 8>}, {pipeline_mode = #tpu.pipeline_mode<synchronous>, transform_indices = @transform_1, window_bounds = array<i64: 112, 128>}, {transform_indices = @transform_2, window_bounds = array<i64: 40, 64>}]} {
    %c96 = arith.constant 96 : index
    %c0 = arith.constant 0 : index
    %0 = vector.load %arg2[%c96, %c0] : memref<112x128xf32, #tpu.memory_space<vmem>>, vector<8x32xf32>
    %c104 = arith.constant 104 : index
    %c0_0 = arith.constant 0 : index
    %1 = vector.load %arg2[%c104, %c0_0] : memref<112x128xf32, #tpu.memory_space<vmem>>, vector<1x32xf32>
    %c0_1 = arith.constant 0 : index
    %c0_2 = arith.constant 0 : index
    %2 = vector.load %arg2[%c0_1, %c0_2] : memref<112x128xf32, #tpu.memory_space<vmem>>, vector<96x64xf32>
    %c105 = arith.constant 105 : index
    %c0_3 = arith.constant 0 : index
    %3 = vector.load %arg2[%c105, %c0_3] : memref<112x128xf32, #tpu.memory_space<vmem>>, vector<1x64xf32>
    %c0_4 = arith.constant 0 : index
    %c120 = arith.constant 120 : index
    %4 = vector.load %arg2[%c0_4, %c120] : memref<112x128xf32, #tpu.memory_space<vmem>>, vector<40x1xf32>
    %c0_5 = arith.constant 0 : index
    %c121 = arith.constant 121 : index
    %5 = vector.load %arg2[%c0_5, %c121] : memref<112x128xf32, #tpu.memory_space<vmem>>, vector<40x1xf32>
    %c0_6 = arith.constant 0 : index
    %c0_7 = arith.constant 0 : index
    %6 = vector.load %arg1[%c0_6, %c0_7] : memref<160x8xf32, #tpu.memory_space<vmem>>, vector<160x8xf32>
    %cst = arith.constant dense<0.000000e+00> : vector<160x32xf32>
    %7 = tpu.matmul %6, %0, %cst {dimension_numbers = #tpu.dot_dimension_numbers<[1], [0], [0], [1], [0, 0, 1, 1], [], []>} : vector<160x8xf32>, vector<8x32xf32>, vector<160x32xf32> -> vector<160x32xf32>
    %8 = vector.broadcast %1 : vector<1x32xf32> to vector<160x32xf32>
    %9 = arith.addf %7, %8 : vector<160x32xf32>
    %cst_8 = arith.constant 0.000000e+00 : f32
    %10 = vector.broadcast %cst_8 : f32 to vector<160x32xf32>
    %11 = arith.maximumf %9, %10 : vector<160x32xf32>
    %12 = vector.extract_strided_slice %11 {offsets = [0, 0], sizes = [40, 32], strides = [1, 1]} : vector<160x32xf32> to vector<40x32xf32>
    %13 = vector.extract_strided_slice %11 {offsets = [40, 0], sizes = [40, 32], strides = [1, 1]} : vector<160x32xf32> to vector<40x32xf32>
    %14 = arith.maximumf %12, %13 : vector<40x32xf32>
    %15 = vector.extract_strided_slice %11 {offsets = [80, 0], sizes = [40, 32], strides = [1, 1]} : vector<160x32xf32> to vector<40x32xf32>
    %16 = vector.extract_strided_slice %11 {offsets = [120, 0], sizes = [40, 32], strides = [1, 1]} : vector<160x32xf32> to vector<40x32xf32>
    %17 = arith.maximumf %15, %16 : vector<40x32xf32>
    %cst_9 = arith.constant 0.000000e+00 : f32
    %18 = vector.broadcast %cst_9 : f32 to vector<1x32xf32>
    %19 = vector.extract_strided_slice %17 {offsets = [0, 0], sizes = [39, 32], strides = [1, 1]} : vector<40x32xf32> to vector<39x32xf32>
    %20 = tpu.concatenate %18, %19 in 0 : vector<1x32xf32>, vector<39x32xf32> -> vector<40x32xf32>
    %21 = vector.broadcast %4 : vector<40x1xf32> to vector<40x32xf32>
    %22 = arith.mulf %21, %20 : vector<40x32xf32>
    %23 = vector.extract_strided_slice %14 {offsets = [1, 0], sizes = [39, 32], strides = [1, 1]} : vector<40x32xf32> to vector<39x32xf32>
    %24 = tpu.concatenate %23, %18 in 0 : vector<39x32xf32>, vector<1x32xf32> -> vector<40x32xf32>
    %25 = vector.broadcast %5 : vector<40x1xf32> to vector<40x32xf32>
    %26 = arith.mulf %25, %24 : vector<40x32xf32>
    %27 = tpu.concatenate %22, %14, %17 in 1 : vector<40x32xf32>, vector<40x32xf32>, vector<40x32xf32> -> vector<40x96xf32>
    %28 = tpu.concatenate %14, %17, %26 in 1 : vector<40x32xf32>, vector<40x32xf32>, vector<40x32xf32> -> vector<40x96xf32>
    %29 = tpu.concatenate %27, %28 in 0 : vector<40x96xf32>, vector<40x96xf32> -> vector<80x96xf32>
    %cst_10 = arith.constant dense<0.000000e+00> : vector<80x64xf32>
    %30 = tpu.matmul %29, %2, %cst_10 {dimension_numbers = #tpu.dot_dimension_numbers<[1], [0], [0], [1], [0, 0, 1, 1], [], []>} : vector<80x96xf32>, vector<96x64xf32>, vector<80x64xf32> -> vector<80x64xf32>
    %31 = vector.extract_strided_slice %30 {offsets = [0, 0], sizes = [40, 64], strides = [1, 1]} : vector<80x64xf32> to vector<40x64xf32>
    %32 = vector.extract_strided_slice %30 {offsets = [40, 0], sizes = [40, 64], strides = [1, 1]} : vector<80x64xf32> to vector<40x64xf32>
    %33 = arith.maximumf %31, %32 : vector<40x64xf32>
    %34 = vector.broadcast %3 : vector<1x64xf32> to vector<40x64xf32>
    %35 = arith.addf %33, %34 : vector<40x64xf32>
    %cst_11 = arith.constant 0.000000e+00 : f32
    %36 = vector.broadcast %cst_11 : f32 to vector<40x64xf32>
    %37 = arith.maximumf %35, %36 : vector<40x64xf32>
    %c0_12 = arith.constant 0 : index
    %c0_13 = arith.constant 0 : index
    %38 = vector.load %arg3[%c0_12, %c0_13] : memref<40x64xf32, #tpu.memory_space<vmem>>, vector<40x64xf32>
    tpu.vector_store %arg3[%c0_12, %c0_13], %37 {strides = array<i32>} : memref<40x64xf32, #tpu.memory_space<vmem>>, vector<40x64xf32>,
    return
  }
  func.func @transform_0(%arg0: i32) -> (i32, i32) {
    %c0_i32 = arith.constant 0 : i32
    %c0_i32_0 = arith.constant 0 : i32
    return %arg0, %c0_i32 : i32, i32
  }
  func.func @transform_1(%arg0: i32) -> (i32, i32) {
    %c0_i32 = arith.constant 0 : i32
    %c0_i32_0 = arith.constant 0 : i32
    %c0_i32_1 = arith.constant 0 : i32
    return %c0_i32, %c0_i32_0 : i32, i32
  }
  func.func @transform_2(%arg0: i32) -> (i32, i32) {
    %c0_i32 = arith.constant 0 : i32
    %c0_i32_0 = arith.constant 0 : i32
    return %arg0, %c0_i32 : i32, i32
  }
}

</mosaic_0001>

<bundles_post_ra>
// kernel: cnn_forward_packed.1
= control target key start
LH: loop header
LB: loop body
LE: loop exit
PB: predicated region body
PF: predicated region fallthrough
CT: control target
= control target key end

     0   :  { %vm50_vm0 = vcmask 64512   ;;  %v843_v3 = vmov 121   ;;  %v844_v18 = vmov 120   ;;  %s845_s12 = smov 32   ;;  %vm362_vm1 = vcmask 1046528   ;;  %s846_s21 = smov 64   ;;  %s1123_s1 = inlined_call_operand.vmem [shape: f32[112,128], index: 1, kind: input, shape index: {}]   ;;  %s1124_s0 = inlined_call_operand.vmem [shape: f32[160,8], index: 0, kind: input, shape index: {}]   ;;  %s1125_s2 = inlined_call_operand.vmem [shape: f32[40,64], index: 2, kind: output, shape index: {}]  }
   0x1   :  { %v11_v0 = vld [vmem:[%s1123_s1 + $0x60] sm:$0xff]  ;;  %v27_v2 = vld [vmem:[%s1124_s0 + $0x8] sm:$0xff]  ;;  %838 = vset.pattern.permute.xlu0 %v843_v3  ;;  %839 = vset.pattern.permute.xlu1 %v843_v3  ;;  %v28_v4 = vld [vmem:[%s1124_s0 + $0x10] sm:$0xff]  ;;  %vm311_vm2 = vcmask 1040384   ;;  %vm433_vm3 = vcmask 261120   ;;  %vm439_vm4 = vcmask 523264  }
   0x2   :  { %v26_v1 = vld [vmem:[%s1124_s0] sm:$0xff]  ;;  %739 = vmatprep.subr.mxu0 %v11_v0  ;;  %v29_v5 = vld [vmem:[%s1124_s0 + $0x18] sm:$0xff]  ;;  %v15_v8 = vld [vmem:[%s1123_s1 + $0x10] sm:$0xff]  ;;  %vm490_vm5 = vcmask 785408  }
   0x3   :  { %741 = vmatprep.mubr.msk.f32.mxu0 %vm50_vm0, %v26_v1  ;;  %740 = vmatpush3.msra.mxu0 %v11_v0  ;;  %v30_v6 = vld [vmem:[%s1124_s0 + $0x20] sm:$0xff]  ;;  %v31_v9 = vld [vmem:[%s1124_s0 + $0x28] sm:$0xff]  ;;  %v32_v10 = vld [vmem:[%s1124_s0 + $0x30] sm:$0xff] }
   0x4   :  { %742 = vmatmul.mubr.msk.f32.vlgmr.msra.gmra.mrb[0].mxu0 %vm50_vm0, %v27_v2  ;;  %v13_v7 = vld [vmem:[%s1123_s1] sm:$0xff]  ;;  %v14_v11 = vld [vmem:[%s1123_s1 + $0x8] sm:$0xff]  ;;  %387 = vperm.xlu1 %839, %v15_v8   ;;  %v16_v12 = vld [vmem:[%s1123_s1 + $0x18] sm:$0xff] }
   0x5   :  { %744 = vmatprep.mubr.msk.f32.mxu0 %vm50_vm0, %v28_v4  ;;  %379 = vperm.xlu0 %838, %v13_v7   ;;  %v33_v13 = vld [vmem:[%s1124_s0 + $0x38] sm:$0xff]  ;;  %v34_v14 = vld [vmem:[%s1124_s0 + $0x40] sm:$0xff]  ;;  %v35_v16 = vld [vmem:[%s1124_s0 + $0x48] sm:$0xff]  ;;  %v810_v33 = vpack.c.bf16 %v14_v11, %v13_v7  ;;  %v814_v38 = vpack.c.bf16 %v16_v12, %v15_v8 }
   0x6   :  { %v17_v15 = vld [vmem:[%s1123_s1 + $0x20] sm:$0xff]  ;;  %v36_v17 = vld [vmem:[%s1124_s0 + $0x50] sm:$0xff]  ;;  %v37_v19 = vld [vmem:[%s1124_s0 + $0x58] sm:$0xff] }
   0x7   :  { %v38_v20 = vld [vmem:[%s1124_s0 + $0x60] sm:$0xff]  ;;  %v39_v21 = vld [vmem:[%s1124_s0 + $0x68] sm:$0xff]  ;;  %v40_v22 = vld [vmem:[%s1124_s0 + $0x70] sm:$0xff]  ;;  %811 = vmatprep.subr.bf16.mxu1 %v810_v33 }
   0x8   :  { %745 = vmatmul.mubr.msk.f32.gmra.mrb[2].mxu0 %vm50_vm0, %v29_v5  ;;  %391 = vperm.xlu1 %839, %v16_v12   ;;  %v41_v23 = vld [vmem:[%s1124_s0 + $0x78] sm:$0xff]  ;;  %v42_v24 = vld [vmem:[%s1124_s0 + $0x80] sm:$0xff]  ;;  %v43_v25 = vld [vmem:[%s1124_s0 + $0x88] sm:$0xff] }
   0x9   :  { %747 = vmatprep.mubr.msk.f32.mxu0 %vm50_vm0, %v30_v6  ;;  %383 = vperm.xlu0 %838, %v14_v11   ;;  %v44_v26 = vld [vmem:[%s1124_s0 + $0x90] sm:$0xff]  ;;  %v45_v27 = vld [vmem:[%s1124_s0 + $0x98] sm:$0xff]  ;;  %v963_v30 = vld [vmem:[%s1123_s1 + $0x68] ss:$0 sm:$0xff] }
   0xa   :  { %813 = vmatpush3.bf16.msra.mxu1 %v810_v33  ;;  %v18_v44 = vld [vmem:[%s1123_s1 + $0x28] sm:$0xff]  ;;  %v19_v50 = vld [vmem:[%s1123_s1 + $0x30] sm:$0xff]  ;;  %v20_v51 = vld [vmem:[%s1123_s1 + $0x38] sm:$0xff] }
   0xb   :  { %815 = vmatprep.subr.bf16.mxu1 %v814_v38  ;;  %v818_v48 = vpack.c.bf16 %v18_v44, %v17_v15  ;;  %v822_v55 = vpack.c.bf16 %v20_v51, %v19_v50 }
   0xc   :  { %748 = vmatmul.mubr.msk.f32.gmra.mrb[4].mxu0 %vm50_vm0, %v31_v9  ;;  %840 = vset.pattern.permute.xlu1 %v844_v18  ;;  %v21_v9 = vld [vmem:[%s1123_s1 + $0x40] sm:$0xff] }
   0xd   :  { %750 = vmatprep.mubr.msk.f32.mxu0 %vm50_vm0, %v32_v10  ;;  %395 = vperm.xlu0 %838, %v17_v15   ;;  %v22_v10 = vld [vmem:[%s1123_s1 + $0x48] sm:$0xff] }
   0xe   :  { %329 = vperm.xlu1 %840, %v13_v7   ;;  %817 = vmatpush3.bf16.msra.mxu1 %v814_v38 }
   0xf   :  { %819 = vmatprep.subr.bf16.mxu1 %v818_v48 }
  0x10   :  { %751 = vmatmul.mubr.msk.f32.gmra.mrb[6].mxu0 %vm50_vm0, %v33_v13 }
  0x11   :  { %753 = vmatprep.mubr.msk.f32.mxu0 %vm50_vm0, %v34_v14  ;;  %841 = vset.pattern.permute.xlu0 %v844_v18  ;;  %v826_v14 = vpack.c.bf16 %v22_v10, %v21_v9 }
  0x12   :  { %334 = vperm.xlu0 %841, %v14_v11   ;;  %339 = vperm.xlu1 %840, %v15_v8  }
  0x13   :  { %821 = vmatpush3.bf16.msra.mxu1 %v818_v48 }
  0x14   :  { %754 = vmatmul.mubr.msk.f32.gmra.mrb[8].mxu0 %vm50_vm0, %v35_v16  ;;  %823 = vmatprep.subr.bf16.mxu1 %v822_v55 }
  0x15   :  { %756 = vmatprep.mubr.msk.f32.mxu0 %vm50_vm0, %v36_v17 }
  0x16   :  { %349 = vperm.xlu0 %841, %v17_v15   ;;  %344 = vperm.xlu1 %840, %v16_v12  }
  0x17   :  { %825 = vmatpush3.bf16.msra.mxu1 %v822_v55 }
  0x18   :  { %757 = vmatmul.mubr.msk.f32.gmra.mrb[10].mxu0 %vm50_vm0, %v37_v19  ;;  %827 = vmatprep.subr.bf16.mxu1 %v826_v14 }
  0x19   :  { %759 = vmatprep.mubr.msk.f32.mxu0 %vm50_vm0, %v38_v20  ;;  %v23_v20 = vld [vmem:[%s1123_s1 + $0x50] sm:$0xff] }
  0x1a   :  { %842 = vset.pattern.permute.xlu0 %v843_v3 }
  0x1b   :  { %829 = vmatpush3.bf16.msra.mxu1 %v826_v14 }
  0x1c   :  { %760 = vmatmul.mubr.msk.f32.gmra.mrb[12].mxu0 %vm50_vm0, %v39_v21  ;;  %v24_v21 = vld [vmem:[%s1123_s1 + $0x58] sm:$0xff] }
  0x1d   :  { %762 = vmatprep.mubr.msk.f32.mxu0 %vm50_vm0, %v40_v22 }
  0x20   :  { %763 = vmatmul.mubr.msk.f32.gmra.mrb[14].mxu0 %vm50_vm0, %v41_v23 }
  0x21   :  { %765 = vmatprep.mubr.msk.f32.mxu0 %vm50_vm0, %v42_v24  ;;  %v830_v24 = vpack.c.bf16 %v24_v21, %v23_v20 }
  0x23   :  { %831 = vmatprep.subr.bf16.mxu1 %v830_v24 }
  0x24   :  { %766 = vmatmul.mubr.msk.f32.gmra.mrb[16].mxu0 %vm50_vm0, %v43_v25  ;;  %833 = vmatpush3.bf16.msra.mxu1 %v830_v24 }
  0x25   :  { %768 = vmatprep.mubr.msk.f32.mxu0 %vm50_vm0, %v44_v26 }
  0x28   :  { %769 = vmatmul.mubr.msk.f32.gmra.mrb[18].mxu0 %vm50_vm0, %v45_v27 }
  0x84   :  { %v380_v60 = vpop.permute.xlu0 %379 }
  0x88   :  { %v384_v16 = vpop.permute.xlu0 %383 }
  0xd7   :  { %v743_v28 = vpop.f32.mrb[0].mxu0 }
  0xd8   :  { %v177_v29 = vpop.f32.mrb[1].mxu0  ;;  %v183_v42 = vadd.f32 %v743_v28, %v963_v30 }
  0xd9   :  { %v178_v34 = vadd.f32 %v963_v30, %v177_v29 }
  0xda   :  { %v277_v56 = vmax.f32 %v183_v42, 0.0 }
  0xdb   :  { %v746_v31 = vpop.f32.mrb[2].mxu0  ;;  %v276_v39 = vmax.f32 %v178_v34, 0.0 }
  0xdc   :  { %v187_v32 = vpop.f32.mrb[3].mxu0  ;;  %v193_v57 = vadd.f32 %v746_v31, %v963_v30 }
  0xdd   :  { %v188_v40 = vadd.f32 %v963_v30, %v187_v32 }
  0xde   :  { %v279_v5 = vmax.f32 %v193_v57, 0.0 }
  0xdf   :  { %v749_v35 = vpop.f32.mrb[4].mxu0  ;;  %v278_v52 = vmax.f32 %v188_v40, 0.0 }
  0xe0   :  { %v203_v36 = vadd.f32 %v749_v35, %v963_v30  ;;  %v197_v37 = vpop.f32.mrb[5].mxu0 }
  0xe1   :  { %v198_v53 = vadd.f32 %v963_v30, %v197_v37 }
  0xe2   :  { %v281_v41 = vmax.f32 %v203_v36, 0.0 }
  0xe3   :  { %v752_v43 = vpop.f32.mrb[6].mxu0  ;;  %v280_v2 = vmax.f32 %v198_v53, 0.0 }
  0xe4   :  { %v972_v45 = vmax.f32 %v276_v39, %v281_v41  ;;  %v213_v46 = vadd.f32 %v752_v43, %v963_v30  ;;  %v207_v47 = vpop.f32.mrb[7].mxu0 }
  0xe5   :  { %v208_v49 = vadd.f32 %v963_v30, %v207_v47 }
  0xe6   :  { %v283_v54 = vmax.f32 %v213_v46, 0.0  ;;  %403 = vrot.lane.b32.xlu1 %v972_v45, %s845_s12  ;;  %v363_v12 = vrot.slane %v972_v45, 1 }
  0xe7   :  { %v282_v58 = vmax.f32 %v208_v49, 0.0  ;;  %v755_v59 = vpop.f32.mrb[8].mxu0 }
  0xe8   :  { %v986_v61 = vmax.f32 %v278_v52, %v283_v54  ;;  %v223_v62 = vadd.f32 %v755_v59, %v963_v30  ;;  %v217_v63 = vpop.f32.mrb[9].mxu0 }
  0xe9   :  { %v989_v0 = vmax.f32 %v277_v56, %v282_v58  ;;  %v218_v1 = vadd.f32 %v963_v30, %v217_v63 }
  0xea   :  { %v285_v3 = vmax.f32 %v223_v62, 0.0  ;;  %407 = vrot.lane.b32.xlu1 %v986_v61, %s845_s12  ;;  %v366_v4 = vrot.slane %v986_v61, 1 }
  0xeb   :  { %v364_v6 = vrot.slane %v989_v0, 1  ;;  %v284_v7 = vmax.f32 %v218_v1, 0.0  ;;  %v758_v8 = vpop.f32.mrb[10].mxu0  ;;  %405 = vrot.lane.b32.xlu0 %v989_v0, %s845_s12 }
  0xec   :  { %v1004_v11 = vmax.f32 %v280_v2, %v285_v3  ;;  %v227_v13 = vpop.f32.mrb[11].mxu0  ;;  %v233_v34 = vadd.f32 %v758_v8, %v963_v30  ;;  %v388_v2 = vpop.permute.xlu1 %387 }
  0xed   :  { %v1007_v15 = vmax.f32 %v279_v5, %v284_v7  ;;  %v367_v17 = vsel %vm362_vm1, %v364_v6, %v366_v4  ;;  %v365_v18 = vsel %vm362_vm1, %v363_v12, %v364_v6  ;;  %v228_v26 = vadd.f32 %v963_v30, %v227_v13 }
  0xee   :  { %411 = vrot.lane.b32.xlu1 %v1004_v11, %s845_s12  ;;  %v399_v22 = vmul.f32 %v384_v16, %v367_v17  ;;  %v398_v25 = vmul.f32 %v380_v60, %v365_v18  ;;  %v287_v43 = vmax.f32 %v233_v34, 0.0  ;;  %v370_v6 = vrot.slane %v1004_v11, 1  ;;  %v396_v16 = vpop.permute.xlu0 %395 }
  0xef   :  { %v761_v19 = vpop.f32.mrb[12].mxu0  ;;  %409 = vrot.lane.b32.xlu0 %v1007_v15, %s845_s12  ;;  %v286_v31 = vmax.f32 %v228_v26, 0.0  ;;  %v368_v5 = vrot.slane %v1007_v15, 1 }
  0xf0   :  { %v237_v23 = vpop.f32.mrb[13].mxu0  ;;  %v243_v44 = vadd.f32 %v761_v19, %v963_v30  ;;  %v392_v10 = vpop.permute.xlu1 %391  ;;  %v377_v17 = vsel %vm362_vm1, %v370_v6, 0.0 }
  0xf1   :  { %v238_v32 = vadd.f32 %v963_v30, %v237_v23  ;;  %v369_v9 = vsel %vm362_vm1, %v366_v4, %v368_v5  ;;  %v371_v12 = vsel %vm362_vm1, %v368_v5, %v370_v6  ;;  %v402_v18 = vmul.f32 %v396_v16, %v377_v17 }
  0xf2   :  { %467 = vrot.lane.b32.xlu1 %v399_v22, %s846_s21  ;;  %v289_v56 = vmax.f32 %v243_v44, 0.0  ;;  %v400_v13 = vmul.f32 %v388_v2, %v369_v9  ;;  %v401_v14 = vmul.f32 %v392_v10, %v371_v12  ;;  %v335_v21 = vpop.permute.xlu0 %334  ;;  %v695_v9 = vld [vmem:[%s1123_s1 + $0x69] ss:$0 sm:$0xff] }
  0xf3   :  { %v764_v27 = vpop.f32.mrb[14].mxu0  ;;  %465 = vrot.lane.b32.xlu0 %v398_v25, %s846_s21  ;;  %v288_v40 = vmax.f32 %v238_v32, 0.0 }
  0xf4   :  { %v253_v28 = vadd.f32 %v764_v27, %v963_v30  ;;  %v247_v29 = vpop.f32.mrb[15].mxu0  ;;  %v330_v4 = vpop.permute.xlu1 %329 }
  0xf5   :  { %v248_v41 = vadd.f32 %v963_v30, %v247_v29 }
  0xf6   :  { %v291_v33 = vmax.f32 %v253_v28, 0.0  ;;  %v350_v23 = vpop.permute.xlu0 %349 }
  0xf7   :  { %v767_v35 = vpop.f32.mrb[16].mxu0  ;;  %v290_v53 = vmax.f32 %v248_v41, 0.0 }
  0xf8   :  { %v1029_v36 = vmax.f32 %v286_v31, %v291_v33  ;;  %v263_v37 = vadd.f32 %v767_v35, %v963_v30  ;;  %v257_v38 = vpop.f32.mrb[17].mxu0  ;;  %v340_v19 = vpop.permute.xlu1 %339 }
  0xf9   :  { %v258_v39 = vadd.f32 %v963_v30, %v257_v38 }
  0xfa   :  { %v293_v42 = vmax.f32 %v263_v37, 0.0  ;;  %418 = vrot.lane.b32.xlu1 %v1029_v36, %s846_s21  ;;  %v312_v57 = vrot.slane %v1029_v36, 7 }
  0xfb   :  { %v292_v46 = vmax.f32 %v258_v39, 0.0  ;;  %v770_v47 = vpop.f32.mrb[18].mxu0 }
  0xfc   :  { %v303_v48 = vmax.f32 %v288_v40, %v293_v42  ;;  %v273_v49 = vadd.f32 %v770_v47, %v963_v30  ;;  %v267_v50 = vpop.f32.mrb[19].mxu0  ;;  %v345_v20 = vpop.permute.xlu1 %344  ;;  %v326_v28 = vsel %vm311_vm2, 0.0, %v312_v57 }
  0xfd   :  { %v302_v51 = vmax.f32 %v287_v43, %v292_v46  ;;  %v268_v52 = vadd.f32 %v963_v30, %v267_v50  ;;  %v352_v31 = vmul.f32 %v330_v4, %v326_v28 }
  0xfe   :  { %v295_v54 = vmax.f32 %v273_v49, 0.0  ;;  %445 = vrot.lane.b32.xlu1 %v1029_v36, %s845_s12  ;;  %449 = vrot.lane.b32.xlu0 %v303_v48, %s845_s12  ;;  %v315_v55 = vrot.slane %v303_v48, 7 }
  0xff   :  { %v294_v58 = vmax.f32 %v268_v52, 0.0  ;;  %v313_v59 = vrot.slane %v302_v51, 7 }
 0x100   :  { %v305_v60 = vmax.f32 %v290_v53, %v295_v54 }
 0x101   :  { %v304_v62 = vmax.f32 %v289_v56, %v294_v58  ;;  %v316_v63 = vsel %vm311_vm2, %v313_v59, %v315_v55  ;;  %v314_v30 = vsel %vm311_vm2, %v312_v57, %v313_v59 }
 0x102   :  { %422 = vrot.lane.b32.xlu1 %v303_v48, %s846_s21  ;;  %420 = vrot.lane.b32.xlu0 %v302_v51, %s846_s21  ;;  %v319_v1 = vrot.slane %v305_v60, 7  ;;  %v354_v38 = vmul.f32 %v340_v19, %v316_v63  ;;  %v353_v39 = vmul.f32 %v335_v21, %v314_v30 }
 0x103   :  { %v317_v3 = vrot.slane %v304_v62, 7 }
 0x105   :  { %v318_v7 = vsel %vm311_vm2, %v315_v55, %v317_v3  ;;  %v320_v8 = vsel %vm311_vm2, %v317_v3, %v319_v1 }
 0x106   :  { %447 = vrot.lane.b32.xlu1 %v302_v51, %s845_s12  ;;  %426 = vrot.lane.b32.xlu0 %v305_v60, %s846_s21  ;;  %v355_v49 = vmul.f32 %v345_v20, %v318_v7  ;;  %v356_v50 = vmul.f32 %v350_v23, %v320_v8 }
 0x10a   :  { %451 = vrot.lane.b32.xlu1 %v304_v62, %s845_s12  ;;  %424 = vrot.lane.b32.xlu0 %v304_v62, %s846_s21 }
 0x10e   :  { %471 = vrot.lane.b32.xlu1 %v401_v14, %s846_s21  ;;  %469 = vrot.lane.b32.xlu0 %v400_v13, %s846_s21 }
 0x112   :  { %453 = vrot.lane.b32.xlu0 %v305_v60, %s845_s12 }
 0x116   :  { %473 = vrot.lane.b32.xlu0 %v402_v18, %s846_s21 }
 0x158   :  { %v404_v22 = vpop.permute.xlu1 %403 }
 0x159   :  { %v434_v32 = vsel %vm433_vm3, %v352_v31, %v404_v22 }
 0x15c   :  { %v408_v24 = vpop.permute.xlu1 %407 }
 0x15d   :  { %v406_v25 = vpop.permute.xlu0 %405  ;;  %v436_v40 = vsel %vm433_vm3, %v354_v38, %v408_v24 }
 0x15e   :  { %v435_v41 = vsel %vm433_vm3, %v353_v39, %v406_v25 }
 0x160   :  { %v412_v26 = vpop.permute.xlu1 %411 }
 0x161   :  { %v410_v27 = vpop.permute.xlu0 %409  ;;  %v438_v53 = vsel %vm433_vm3, %v356_v50, %v412_v26 }
 0x162   :  { %v437_v51 = vsel %vm433_vm3, %v355_v49, %v410_v27 }
 0x164   :  { %v468_v29 = vpop.permute.xlu1 %467 }
 0x165   :  { %v466_v33 = vpop.permute.xlu0 %465 }
 0x16c   :  { %v419_v34 = vpop.permute.xlu1 %418 }
 0x16d   :  { %v440_v35 = vsel %vm439_vm4, %v434_v32, %v419_v34 }
 0x16e   :  { %795 = vmatprep.mubr.msk.f32.mxu1 %vm490_vm5, %v440_v35 }
 0x170   :  { %v446_v36 = vpop.permute.xlu1 %445  ;;  %v450_v37 = vpop.permute.xlu0 %449 }
 0x171   :  { %v480_v56 = vsel %vm433_vm3, %v972_v45, %v446_v36  ;;  %v482_v45 = vsel %vm433_vm3, %v986_v61, %v450_v37 }
 0x172   :  { %v485_v60 = vsel %vm439_vm4, %v480_v56, %v466_v33 }
 0x174   :  { %v423_v42 = vpop.permute.xlu1 %422  ;;  %v421_v43 = vpop.permute.xlu0 %420 }
 0x175   :  { %v442_v44 = vsel %vm439_vm4, %v436_v40, %v423_v42  ;;  %v441_v46 = vsel %vm439_vm4, %v435_v41, %v421_v43 }
 0x176   :  { %796 = vmatmul.mubr.msk.f32.vlgmr.msra.gmra.mrb[0].mxu1 %vm490_vm5, %v441_v46 }
 0x177   :  { %798 = vmatprep.mubr.msk.f32.mxu1 %vm490_vm5, %v442_v44 }
 0x178   :  { %v448_v47 = vpop.permute.xlu1 %447  ;;  %v427_v48 = vpop.permute.xlu0 %426 }
 0x179   :  { %v444_v57 = vsel %vm439_vm4, %v438_v53, %v427_v48  ;;  %v481_v58 = vsel %vm433_vm3, %v989_v0, %v448_v47 }
 0x17a   :  { %v486_v62 = vsel %vm439_vm4, %v481_v58, %v468_v29 }
 0x17c   :  { %v425_v52 = vpop.permute.xlu0 %424  ;;  %v452_v54 = vpop.permute.xlu1 %451 }
 0x17d   :  { %v443_v55 = vsel %vm439_vm4, %v437_v51, %v425_v52  ;;  %v483_v1 = vsel %vm433_vm3, %v1007_v15, %v452_v54 }
 0x17e   :  { %799 = vmatmul.mubr.msk.f32.gmra.mrb[2].mxu1 %vm490_vm5, %v443_v55 }
 0x17f   :  { %801 = vmatprep.mubr.msk.f32.mxu1 %vm490_vm5, %v444_v57 }
 0x180   :  { %v470_v59 = vpop.permute.xlu0 %469  ;;  %v472_v63 = vpop.permute.xlu1 %471 }
 0x181   :  { %v487_v0 = vsel %vm439_vm4, %v482_v45, %v470_v59  ;;  %v488_v2 = vsel %vm439_vm4, %v483_v1, %v472_v63 }
 0x182   :  { %802 = vmatmul.mubr.msk.f32.gmra.mrb[4].mxu1 %vm490_vm5, %v485_v60 }
 0x183   :  { %804 = vmatprep.mubr.msk.f32.mxu1 %vm490_vm5, %v486_v62 }
 0x184   :  { %v454_v30 = vpop.permute.xlu0 %453 }
 0x185   :  { %v484_v3 = vsel %vm433_vm3, %v1004_v11, %v454_v30 }
 0x186   :  { %805 = vmatmul.mubr.msk.f32.gmra.mrb[6].mxu1 %vm490_vm5, %v487_v0 }
 0x187   :  { %807 = vmatprep.mubr.msk.f32.mxu1 %vm490_vm5, %v488_v2 }
 0x188   :  { %v474_v5 = vpop.permute.xlu0 %473 }
 0x189   :  { %v489_v6 = vsel %vm439_vm4, %v484_v3, %v474_v5 }
 0x18a   :  { %808 = vmatmul.mubr.msk.f32.gmra.mrb[8].mxu1 %vm490_vm5, %v489_v6 }
 0x249   :  { %v797_v61 = vpop.f32.mrb[0].mxu1 }
 0x24a   :  { %v587_v7 = vpop.f32.mrb[1].mxu1 }
 0x251   :  { %v800_v8 = vpop.f32.mrb[2].mxu1 }
 0x252   :  { %v597_v15 = vpop.f32.mrb[3].mxu1 }
 0x255   :  { %v803_v10 = vpop.f32.mrb[4].mxu1 }
 0x256   :  { %v636_v12 = vmax.f32 %v587_v7, %v803_v10  ;;  %v607_v13 = vpop.f32.mrb[5].mxu1 }
 0x258   :  { %v645_v14 = vadd.f32 %v695_v9, %v636_v12 }
 0x259   :  { %v806_v16 = vpop.f32.mrb[6].mxu1 }
 0x25a   :  { %v650_v17 = vmax.f32 %v645_v14, 0.0  ;;  %v638_v11 = vmax.f32 %v597_v15, %v806_v16  ;;  %v617_v18 = vpop.f32.mrb[7].mxu1 }
 0x25b   :  { %v637_v4 = vmax.f32 %v797_v61, %v617_v18 }
 0x25c   :  { %655 = vst.msk [vmem:[%s1125_s2] sm:$0xff] %vm439_vm4, %v650_v17  ;;  %v647_v19 = vadd.f32 %v695_v9, %v638_v11 }
 0x25d   :  { %v646_v20 = vadd.f32 %v695_v9, %v637_v4  ;;  %v809_v21 = vpop.f32.mrb[8].mxu1 }
 0x25e   :  { %v652_v22 = vmax.f32 %v647_v19, 0.0  ;;  %v640_v23 = vmax.f32 %v607_v13, %v809_v21  ;;  %v627_v24 = vpop.f32.mrb[9].mxu1 }
 0x25f   :  { %v651_v25 = vmax.f32 %v646_v20, 0.0  ;;  %v639_v26 = vmax.f32 %v800_v8, %v627_v24 }
 0x260   :  { %657 = vst.msk [vmem:[%s1125_s2 + $0x10] sm:$0xff] %vm439_vm4, %v652_v22  ;;  %v649_v27 = vadd.f32 %v695_v9, %v640_v23 }
 0x261   :  { %656 = vst.msk [vmem:[%s1125_s2 + $0x8] sm:$0xff] %vm439_vm4, %v651_v25  ;;  %v648_v28 = vadd.f32 %v695_v9, %v639_v26 }
 0x262   :  { %v654_v29 = vmax.f32 %v649_v27, 0.0 }
 0x263   :  { %v653_v31 = vmax.f32 %v648_v28, 0.0 }
 0x264   :  { %659 = vst.msk [vmem:[%s1125_s2 + $0x20] sm:$0xff] %vm439_vm4, %v654_v29 }
 0x265   :  { %658 = vst.msk [vmem:[%s1125_s2 + $0x18] sm:$0xff] %vm439_vm4, %v653_v31 }

</bundles_post_ra>
